<compile_context>
chip_gen: v7x
topology: tpu7x:2x2x1
jax: 0.10.0
libtpu: 0.0.40
codegen_flags: <defaults>
</compile_context>

<pallas_src>
import jax
import jax.numpy as jnp
from jax.experimental import pallas as pl
from jax.experimental.pallas import tpu as pltpu


def _round_up(x: int, m: int) -> int:
    return ((x + m - 1) // m) * m


def _vmem_cap_bytes() -> int:
    """Physical per-core VMEM capacity (conservative fallback: v7x's 64 MiB)."""
    try:
        cap = int(getattr(pltpu.get_tpu_info(), "vmem_capacity_bytes", 0))
        if cap > 0:
            return cap
    except Exception:
        pass
    return 64 << 20


def _semisl_head_kernel(x_ref, w1_ref, b1_ref, w2_ref, b2_ref, o_ref):
    """Fused MLP head: Linear(+folded BN) -> ReLU -> Linear."""
    # fc1 on the MXU, f32 accumulation. BN scale is folded into w1,
    # BN shift + fc1 bias are folded into b1.
    h = jnp.dot(x_ref[...], w1_ref[...], preferred_element_type=jnp.float32)  # [TN, Hp]
    h = jnp.maximum(h + b1_ref[...], jnp.float32(0.0))                        # bias + ReLU (VPU)
    # fc2 on the MXU (h cast to the weight compute dtype; no-op for f32).
    out = jnp.dot(h.astype(w2_ref.dtype), w2_ref[...],
                  preferred_element_type=jnp.float32)                         # [TN, Kp]
    o_ref[...] = (out + b2_ref[...]).astype(o_ref.dtype)


def semisl_nonlinear_cls_head_forward(feats, params, *,
                                      compute_dtype=jnp.bfloat16,
                                      out_dtype=jnp.float32,
                                      batch_tile: int = 512):
    """Wrapper around pallas_call.

    feats: [N, in_channels] float32 (or a tuple/list; last element is used)
    params: dict with w1 [Cin,H], b1 [H], bn_{gamma,beta,mean,var} [H],
            w2 [H,K], b2 [K]
    compute_dtype: dtype fed to the MXU (bf16 default for deployment;
                   accumulation stays f32 either way).
    out_dtype: dtype of the returned logits (f32 default; bf16 halves the
               output writeback when downstream accepts it).
    returns logits [N, num_classes] in out_dtype.
    """
    if isinstance(feats, (tuple, list)):
        feats = feats[-1]
    feats = jnp.asarray(feats)

    n, cin = feats.shape
    hid = params["w1"].shape[1]
    num_classes = params["w2"].shape[1]
    eps = 1e-5

    itemsize = jnp.dtype(compute_dtype).itemsize
    out_itemsize = jnp.dtype(out_dtype).itemsize

    # ---- Fold BatchNorm1d (inference / running-stats form) into fc1 ----
    scale = params["bn_gamma"] * jax.lax.rsqrt(params["bn_var"] + eps)   # [H]
    w1 = params["w1"] * scale[None, :]                                   # [Cin, H]
    b1 = (params["b1"] - params["bn_mean"]) * scale + params["bn_beta"]  # [H]
    w2, b2 = params["w2"], params["b2"]

    # ---- Pad contraction dims (cin, hid) and class dim for MXU/lane density ----
    contr_align = 256 if itemsize < 4 else 128    # 256-wide MXU on v6e/v7x (bf16/fp8)
    cin_pad = _round_up(cin, contr_align)
    hid_pad = _round_up(hid, contr_align)
    k_pad = _round_up(num_classes, 128)           # lane-dense output tile

    x = feats
    if cin_pad != cin:
        x = jnp.pad(x, ((0, 0), (0, cin_pad - cin)))
    if cin_pad != cin or hid_pad != hid:
        w1 = jnp.pad(w1, ((0, cin_pad - cin), (0, hid_pad - hid)))
    if hid_pad != hid:
        b1 = jnp.pad(b1, ((0, hid_pad - hid),))
    if hid_pad != hid or k_pad != num_classes:
        w2 = jnp.pad(w2, ((0, hid_pad - hid), (0, k_pad - num_classes)))
    if k_pad != num_classes:
        b2 = jnp.pad(b2, ((0, k_pad - num_classes),))

    # ---- Batch tiling: dtype-aware sublanes, >=2 tiles if possible, small tail ----
    sublane = 8 * max(1, 4 // itemsize)           # 8 f32, 16 bf16, 32 int8/fp8
    n_sub = _round_up(n, sublane)
    nb = max(pl.cdiv(n_sub, batch_tile), 2 if n_sub >= 2 * sublane else 1)
    tn = _round_up(pl.cdiv(n_sub, nb), sublane)
    nb = pl.cdiv(n_sub, tn)
    n_pad = nb * tn
    if n_pad != n:
        x = jnp.pad(x, ((0, n_pad - n), (0, 0)))

    # dtype prep: matmul operands in compute_dtype, biases stay f32.
    x = x.astype(compute_dtype)
    w1 = w1.astype(compute_dtype)
    w2 = w2.astype(compute_dtype)
    b1 = b1.astype(jnp.float32).reshape(1, hid_pad)
    b2 = b2.astype(jnp.float32).reshape(1, k_pad)

    # ---- Cost estimate ----
    flops = 2 * n_pad * (cin_pad * hid_pad + hid_pad * k_pad)
    bytes_accessed = (n_pad * cin_pad * itemsize                         # x
                      + cin_pad * hid_pad * itemsize                     # w1
                      + hid_pad * k_pad * itemsize                       # w2
                      + (hid_pad + k_pad) * 4                            # biases
                      + n_pad * k_pad * out_itemsize)                    # out
    cost = pl.CostEstimate(flops=flops, transcendentals=0,
                           bytes_accessed=bytes_accessed)

    # ---- VMEM budget: x/out double buffers + resident weights + h scratch ----
    weight_bytes = ((cin_pad * hid_pad + hid_pad * k_pad) * itemsize
                    + (hid_pad + k_pad) * 4)
    vmem_needed = (2 * tn * cin_pad * itemsize        # double-buffered x tiles
                   + 2 * tn * k_pad * out_itemsize    # double-buffered out tiles
                   + 2 * weight_bytes                 # resident weights (+ spare buffer)
                   + tn * hid_pad * 4                 # intermediate h tile (f32)
                   + (4 << 20))                       # compiler-internal headroom
    cap = _vmem_cap_bytes()
    vmem_limit = int(min(max(vmem_needed, 16 << 20), int(0.8 * cap)))

    out = pl.pallas_call(
        _semisl_head_kernel,
        out_shape=jax.ShapeDtypeStruct((n_pad, k_pad), out_dtype),
        grid=(nb,),
        in_specs=[
            pl.BlockSpec((tn, cin_pad), lambda i: (i, 0)),      # x tile (per grid step)
            pl.BlockSpec((cin_pad, hid_pad), lambda i: (0, 0)),  # w1 (VMEM-resident)
            pl.BlockSpec((1, hid_pad), lambda i: (0, 0)),        # fused bias1 (resident)
            pl.BlockSpec((hid_pad, k_pad), lambda i: (0, 0)),    # w2 (resident)
            pl.BlockSpec((1, k_pad), lambda i: (0, 0)),          # bias2 (resident)
        ],
        out_specs=pl.BlockSpec((tn, k_pad), lambda i: (i, 0)),
        compiler_params=pltpu.CompilerParams(
            dimension_semantics=("parallel",),   # v7x: shard batch tiles over 2 TCs
            vmem_limit_bytes=vmem_limit,
        ),
        cost_estimate=cost,
    )(x, w1, b1, w2, b2)

    # Strip batch and class padding (plain-JAX glue).
    return out[:n, :num_classes]


def init_params(key, in_channels, hid_channels, num_classes):
    """Init matching OTXSemiSLNonLinearClsHead.init_weights():
       Linear: normal(mean=0, std=0.01), bias=0.  BatchNorm1d: weight=1,
       bias=0, running_mean=0, running_var=1."""
    k1, k2 = jax.random.split(key)
    return {
        "w1": 0.01 * jax.random.normal(k1, (in_channels, hid_channels), jnp.float32),
        "b1": jnp.zeros((hid_channels,), jnp.float32),
        "bn_gamma": jnp.ones((hid_channels,), jnp.float32),
        "bn_beta": jnp.zeros((hid_channels,), jnp.float32),
        "bn_mean": jnp.zeros((hid_channels,), jnp.float32),
        "bn_var": jnp.ones((hid_channels,), jnp.float32),
        "w2": 0.01 * jax.random.normal(k2, (hid_channels, num_classes), jnp.float32),
        "b2": jnp.zeros((num_classes,), jnp.float32),
    }


def _reference_forward(feats, params, eps=1e-5):
    """Pure-JAX reference (eval-mode BatchNorm, no folding)."""
    h = feats @ params["w1"] + params["b1"]
    h = (h - params["bn_mean"]) / jnp.sqrt(params["bn_var"] + eps) \
        * params["bn_gamma"] + params["bn_beta"]
    h = jnp.maximum(h, 0.0)
    return h @ params["w2"] + params["b2"]


if __name__ == "__main__":
    # Small shapes consistent with the module: feature vectors of
    # in_channels=32, hid_channels=256, num_classes=16.
    batch = 8
    in_channels = 32
    hid_channels = 256
    num_classes = 16

    key = jax.random.PRNGKey(0)
    kx, kx2, kp, kb = jax.random.split(key, 4)
    feats = jax.random.normal(kx, (batch, in_channels), jnp.float32)
    params = init_params(kp, in_channels, hid_channels, num_classes)

    # Non-trivial BatchNorm running statistics so the folded-BN path is
    # actually exercised (init_weights() defaults make BN the identity).
    kg, kbt, km, kv = jax.random.split(kb, 4)
    params["bn_gamma"] = 1.0 + 0.1 * jax.random.normal(kg, (hid_channels,), jnp.float32)
    params["bn_beta"] = 0.05 * jax.random.normal(kbt, (hid_channels,), jnp.float32)
    params["bn_mean"] = 0.02 * jax.random.normal(km, (hid_channels,), jnp.float32)
    params["bn_var"] = 1.0 + 0.1 * jax.random.uniform(kv, (hid_channels,), jnp.float32)

    ref = _reference_forward(feats, params)

    # 1) f32 path (tight tolerance), tuple input exercises the Sequence glue.
    logits = semisl_nonlinear_cls_head_forward((feats,), params,
                                               compute_dtype=jnp.float32)
    jax.block_until_ready(logits)
    assert logits.shape == (batch, num_classes)
    assert jnp.allclose(logits, ref, atol=1e-5, rtol=1e-5)

    # 2) f32 path with a larger batch so the grid has >= 2 tiles
    #    (exercises the multi-tile / dual-TensorCore path).
    batch2 = 48
    feats2 = jax.random.normal(kx2, (batch2, in_channels), jnp.float32)
    logits2 = semisl_nonlinear_cls_head_forward(feats2, params,
                                                compute_dtype=jnp.float32)
    jax.block_until_ready(logits2)
    ref2 = _reference_forward(feats2, params)
    assert logits2.shape == (batch2, num_classes)
    assert jnp.allclose(logits2, ref2, atol=1e-5, rtol=1e-5)

    # 3) bf16 deployment path (default compute dtype), loose tolerance.
    logits_bf16 = semisl_nonlinear_cls_head_forward(feats, params)
    jax.block_until_ready(logits_bf16)
    assert logits_bf16.shape == (batch, num_classes)
    assert jnp.allclose(logits_bf16.astype(jnp.float32), ref, atol=1e-2, rtol=5e-2)

    print("KERNEL_OK")
</pallas_src>

<mosaic_0001>
module attributes {stable_mosaic.version = 11 : i64} {
  func.func @_semisl_head_kernel(%arg0: i32, %arg1: memref<8x128xf32, #tpu.memory_space<vmem>>, %arg2: memref<128x256xf32, #tpu.memory_space<vmem>>, %arg3: memref<1x256xf32, #tpu.memory_space<vmem>>, %arg4: memref<256x128xf32, #tpu.memory_space<vmem>>, %arg5: memref<1x128xf32, #tpu.memory_space<vmem>>, %arg6: memref<8x128xf32, #tpu.memory_space<vmem>>) attributes {dimension_semantics = [#tpu.dimension_semantics<parallel>], iteration_bounds = array<i64: 1>, scalar_prefetch = 0 : i64, scratch_operands = 0 : i64, tpu.core_type = #tpu.core_type<tc>, window_params = [{transform_indices = @transform_0, window_bounds = array<i64: 8, 128>}, {pipeline_mode = #tpu.pipeline_mode<synchronous>, transform_indices = @transform_1, window_bounds = array<i64: 128, 256>}, {pipeline_mode = #tpu.pipeline_mode<synchronous>, transform_indices = @transform_2, window_bounds = array<i64: 1, 256>}, {pipeline_mode = #tpu.pipeline_mode<synchronous>, transform_indices = @transform_3, window_bounds = array<i64: 256, 128>}, {pipeline_mode = #tpu.pipeline_mode<synchronous>, transform_indices = @transform_4, window_bounds = array<i64: 1, 128>}, {transform_indices = @transform_5, window_bounds = array<i64: 8, 128>}]} {
    %c0 = arith.constant 0 : index
    %c0_0 = arith.constant 0 : index
    %0 = vector.load %arg1[%c0, %c0_0] : memref<8x128xf32, #tpu.memory_space<vmem>>, vector<8x128xf32>
    %c0_1 = arith.constant 0 : index
    %c0_2 = arith.constant 0 : index
    %1 = vector.load %arg2[%c0_1, %c0_2] : memref<128x256xf32, #tpu.memory_space<vmem>>, vector<128x256xf32>
    %cst = arith.constant dense<0.000000e+00> : vector<8x256xf32>
    %2 = tpu.matmul %0, %1, %cst {dimension_numbers = #tpu.dot_dimension_numbers<[1], [0], [0], [1], [0, 0, 1, 1], [], []>} : vector<8x128xf32>, vector<128x256xf32>, vector<8x256xf32> -> vector<8x256xf32>
    %c0_3 = arith.constant 0 : index
    %c0_4 = arith.constant 0 : index
    %3 = vector.load %arg3[%c0_3, %c0_4] : memref<1x256xf32, #tpu.memory_space<vmem>>, vector<1x256xf32>
    %4 = vector.broadcast %3 : vector<1x256xf32> to vector<8x256xf32>
    %5 = arith.addf %2, %4 : vector<8x256xf32>
    %cst_5 = arith.constant 0.000000e+00 : f32
    %6 = vector.broadcast %cst_5 : f32 to vector<8x256xf32>
    %7 = arith.maximumf %5, %6 : vector<8x256xf32>
    %c0_6 = arith.constant 0 : index
    %c0_7 = arith.constant 0 : index
    %8 = vector.load %arg4[%c0_6, %c0_7] : memref<256x128xf32, #tpu.memory_space<vmem>>, vector<256x128xf32>
    %cst_8 = arith.constant dense<0.000000e+00> : vector<8x128xf32>
    %9 = tpu.matmul %7, %8, %cst_8 {dimension_numbers = #tpu.dot_dimension_numbers<[1], [0], [0], [1], [0, 0, 1, 1], [], []>} : vector<8x256xf32>, vector<256x128xf32>, vector<8x128xf32> -> vector<8x128xf32>
    %c0_9 = arith.constant 0 : index
    %c0_10 = arith.constant 0 : index
    %10 = vector.load %arg5[%c0_9, %c0_10] : memref<1x128xf32, #tpu.memory_space<vmem>>, vector<1x128xf32>
    %11 = vector.broadcast %10 : vector<1x128xf32> to vector<8x128xf32>
    %12 = arith.addf %9, %11 : vector<8x128xf32>
    %c0_11 = arith.constant 0 : index
    %c0_12 = arith.constant 0 : index
    %13 = vector.load %arg6[%c0_11, %c0_12] : memref<8x128xf32, #tpu.memory_space<vmem>>, vector<8x128xf32>
    tpu.vector_store %arg6[%c0_11, %c0_12], %12 {strides = array<i32>} : memref<8x128xf32, #tpu.memory_space<vmem>>, vector<8x128xf32>,
    return
  }
  func.func @transform_0(%arg0: i32) -> (i32, i32) {
    %c0_i32 = arith.constant 0 : i32
    %c0_i32_0 = arith.constant 0 : i32
    return %arg0, %c0_i32 : i32, i32
  }
  func.func @transform_1(%arg0: i32) -> (i32, i32) {
    %c0_i32 = arith.constant 0 : i32
    %c0_i32_0 = arith.constant 0 : i32
    %c0_i32_1 = arith.constant 0 : i32
    return %c0_i32, %c0_i32_0 : i32, i32
  }
  func.func @transform_2(%arg0: i32) -> (i32, i32) {
    %c0_i32 = arith.constant 0 : i32
    %c0_i32_0 = arith.constant 0 : i32
    %c0_i32_1 = arith.constant 0 : i32
    return %c0_i32, %c0_i32_0 : i32, i32
  }
  func.func @transform_3(%arg0: i32) -> (i32, i32) {
    %c0_i32 = arith.constant 0 : i32
    %c0_i32_0 = arith.constant 0 : i32
    %c0_i32_1 = arith.constant 0 : i32
    return %c0_i32, %c0_i32_0 : i32, i32
  }
  func.func @transform_4(%arg0: i32) -> (i32, i32) {
    %c0_i32 = arith.constant 0 : i32
    %c0_i32_0 = arith.constant 0 : i32
    %c0_i32_1 = arith.constant 0 : i32
    return %c0_i32, %c0_i32_0 : i32, i32
  }
  func.func @transform_5(%arg0: i32) -> (i32, i32) {
    %c0_i32 = arith.constant 0 : i32
    %c0_i32_0 = arith.constant 0 : i32
    return %arg0, %c0_i32 : i32, i32
  }
}

</mosaic_0001>

<bundles_post_ra>
// kernel: tpu_custom_call.1
= control target key start
LH: loop header
LB: loop body
LE: loop exit
PB: predicated region body
PF: predicated region fallthrough
CT: control target
= control target key end

     0   :  { %10 = vsyncpa [#allocation3], 0  ;;  %s600_s0 = inlined_call_operand.hbm [shape: f32[8,128], index: 0, kind: input, shape index: {}]   ;;  %s601_s1 = inlined_call_operand.hbm [shape: f32[128,256], index: 1, kind: input, shape index: {}]   ;;  %s602_s2 = inlined_call_operand.vmem [shape: f32[1,256], index: 2, kind: input, shape index: {}]   ;;  %s603_s3 = inlined_call_operand.hbm [shape: f32[256,128], index: 3, kind: input, shape index: {}]   ;;  %s604_s4 = inlined_call_operand.vmem [shape: f32[1,128], index: 4, kind: input, shape index: {}]   ;;  %s605_s5 = inlined_call_operand.hbm [shape: f32[8,128], index: 5, kind: output, shape index: {}]  }
   0x1   :  { %11 = vsyncpa [#allocation6], 0 }
   0x2   :  { %12 = vsyncpa [#allocation4], 0  ;;  %s507_s18 = smov [#allocation5]   ;;  %s413_s22 = scalar_lea.hbm %s601_s1, 4096 }
   0x3   :  { %s28_s19 = sshll.u32 %s507_s18, 4  ;;  %p414_p0 = scmp.ne.s32.totalorder %s601_s1, %s413_s22  ;;  %s29_s19 = int_to_ptr.vmem [resolvable:$true] %s28_s19 }
   0x4   :  { %p417_p1 = scmp.lt.u32.totalorder %s413_s22, %s601_s1 }
   0x6   :  { %p419_p2 = pnand %p417_p1, %p414_p0 }
   0x8   :  { %422 = shalt.err (!%p419_p2)
}
   0x9   :  { %s423_s27 = scalar_lea.vmem %s29_s19, 4096  ;;  %p428_p4 = scmp.lt.s32.totalorder %s29_s19, %s29_s19 }
   0xa   :  { %p424_p3 = scmp.ne.s32.totalorder %s29_s19, %s423_s27  ;;  %p429_p5 = scmp.lt.s32.totalorder %s423_s27, %s423_s27 }
   0xc   :  { %p430_p6 = por %p429_p5, %p428_p4 }
   0xe   :  { %p431_p7 = pnand %p430_p6, %p424_p3 }
  0x10   :  { %434 = shalt.err (!%p431_p7)
}
  0x11   :  { %s508_s28 = smov 256   ;;  %s509_s29 = smov 16  }
  0x12   :  { %34 = dma.hbm_to_vmem [thread:$0]  %s601_s1, 4096, %s29_s19, [#allocation6], %s508_s28, %s508_s28, %s509_s29  }
  0x13   :  { %s510_s7 = smov [#allocation2]   ;;  %s511_s9 = smov [#allocation7]  }
  0x14   :  { %s19_s8 = sshll.u32 %s510_s7, 4  ;;  %s42_s10 = sshll.u32 %s511_s9, 4  ;;  %s20_s8 = int_to_ptr.vmem [resolvable:$true] %s19_s8  ;;  %s43_s10 = int_to_ptr.vmem [resolvable:$true] %s42_s10 }
  0x15   :  { %s435_s13 = scalar_lea.hbm %s600_s0, 128 }
  0x16   :  { %p436_p8 = scmp.ne.s32.totalorder %s600_s0, %s435_s13  ;;  %p439_p9 = scmp.lt.u32.totalorder %s435_s13, %s600_s0 }
  0x18   :  { %p441_p10 = pnand %p439_p9, %p436_p8 }
  0x1a   :  { %444 = shalt.err (!%p441_p10)
}
  0x1b   :  { %s445_s1 = scalar_lea.vmem %s20_s8, 128  ;;  %p450_p12 = scmp.lt.s32.totalorder %s20_s8, %s20_s8 }
  0x1c   :  { %p446_p11 = scmp.ne.s32.totalorder %s20_s8, %s445_s1  ;;  %p451_p13 = scmp.lt.s32.totalorder %s445_s1, %s445_s1 }
  0x1e   :  { %p452_p0 = por %p451_p13, %p450_p12 }
  0x20   :  { %p453_p1 = pnand %p452_p0, %p446_p11 }
  0x22   :  { %456 = shalt.err (!%p453_p1)
}
  0x23   :  { %22 = dma.hbm_to_vmem [thread:$0]  %s600_s0, 128, %s20_s8, [#allocation3]  }
  0x24   :  { %s457_s22 = scalar_lea.hbm %s603_s3, 4096 }
  0x25   :  { %p458_p2 = scmp.ne.s32.totalorder %s603_s3, %s457_s22  ;;  %p461_p3 = scmp.lt.u32.totalorder %s457_s22, %s603_s3 }
  0x27   :  { %p463_p4 = pnand %p461_p3, %p458_p2 }
  0x29   :  { %466 = shalt.err (!%p463_p4)
}
  0x2a   :  { %s467_s27 = scalar_lea.vmem %s43_s10, 4096  ;;  %p472_p6 = scmp.lt.s32.totalorder %s43_s10, %s43_s10 }
  0x2b   :  { %p468_p5 = scmp.ne.s32.totalorder %s43_s10, %s467_s27  ;;  %p473_p7 = scmp.lt.s32.totalorder %s467_s27, %s467_s27 }
  0x2d   :  { %p474_p8 = por %p473_p7, %p472_p6 }
  0x2f   :  { %p475_p9 = pnand %p474_p8, %p468_p5 }
  0x31   :  { %478 = shalt.err (!%p475_p9)
}
  0x32   :  { %s512_s0 = smov 128   ;;  %s513_s28 = smov 8  }
  0x33   :  { %48 = dma.hbm_to_vmem [thread:$0]  %s603_s3, 4096, %s43_s10, [#allocation6], %s512_s0, %s512_s0, %s513_s28  }
  0x34   :  { %501 = dma.done.wait [#allocation3], 128  }
  0x35   :  { %502 = vsyncadd [#allocation3], 4294967168 }
  0x36   :  { %503 = dma.done.wait [#allocation6], 8192  }
  0x37   :  { %504 = vsyncadd [#allocation6], 4294959104  ;;  %v514_v0 = vmov 0.0   ;;  %v62_v1 = vld [vmem:[#allocation5 + $0x8] sm:$0xff]  ;;  %v64_v2 = vld [vmem:[#allocation5 + $0x18] sm:$0xff]  ;;  %s515_s9 = smov [#allocation8]  }
  0x38   :  { %169 = vmatprep.mubr.f32.mxu0 %v514_v0  ;;  %v61_v3 = vld [vmem:[#allocation5] sm:$0xff]  ;;  %v340_v4 = vpack.c.bf16 %v64_v2, %v62_v1  ;;  %v63_v5 = vld [vmem:[#allocation5 + $0x10] sm:$0xff]  ;;  %v66_v6 = vld [vmem:[#allocation5 + $0x28] sm:$0xff]  ;;  %s294_s10 = sshll.u32 %s515_s9, 4  ;;  %s295_s10 = int_to_ptr.vmem [resolvable:$true] %s294_s10 }
  0x39   :  { %v68_v7 = vld [vmem:[#allocation5 + $0x38] sm:$0xff]  ;;  %v342_v8 = vpack.c.bf16 %v63_v5, %v61_v3  ;;  %v65_v10 = vld [vmem:[#allocation5 + $0x20] sm:$0xff]  ;;  %v67_v11 = vld [vmem:[#allocation5 + $0x30] sm:$0xff]  ;;  %p484_p11 = scmp.lt.s32.totalorder %s295_s10, %s295_s10 }
  0x3a   :  { %v344_v9 = vpack.c.bf16 %v68_v7, %v66_v6  ;;  %v70_v12 = vld [vmem:[#allocation5 + $0x48] sm:$0xff]  ;;  %341 = vmatprep.subr.bf16.mxu0 %v340_v4  ;;  %v72_v13 = vld [vmem:[#allocation5 + $0x58] sm:$0xff]  ;;  %v346_v14 = vpack.c.bf16 %v67_v11, %v65_v10  ;;  %v69_v16 = vld [vmem:[#allocation5 + $0x40] sm:$0xff] }
  0x3b   :  { %343 = vmatpush1.bf16.msra.mxu0 %v342_v8  ;;  %v348_v15 = vpack.c.bf16 %v72_v13, %v70_v12  ;;  %v71_v17 = vld [vmem:[#allocation5 + $0x50] sm:$0xff]  ;;  %v74_v18 = vld [vmem:[#allocation5 + $0x68] sm:$0xff]  ;;  %v76_v19 = vld [vmem:[#allocation5 + $0x78] sm:$0xff] }
  0x3c   :  { %345 = vmatprep.subr.bf16.mxu0 %v344_v9  ;;  %v350_v20 = vpack.c.bf16 %v71_v17, %v69_v16  ;;  %v352_v21 = vpack.c.bf16 %v76_v19, %v74_v18  ;;  %v73_v22 = vld [vmem:[#allocation5 + $0x60] sm:$0xff]  ;;  %v75_v23 = vld [vmem:[#allocation5 + $0x70] sm:$0xff]  ;;  %v78_v24 = vld [vmem:[#allocation5 + $0x88] sm:$0xff] }
  0x3d   :  { %v80_v25 = vld [vmem:[#allocation5 + $0x98] sm:$0xff]  ;;  %v77_v26 = vld [vmem:[#allocation5 + $0x80] sm:$0xff]  ;;  %v79_v27 = vld [vmem:[#allocation5 + $0x90] sm:$0xff]  ;;  %v354_v31 = vpack.c.bf16 %v75_v23, %v73_v22 }
  0x3e   :  { %v194_v28 = vld [vmem:[#allocation7 + $0x80] sm:$0xff]  ;;  %v195_v29 = vld [vmem:[#allocation7 + $0x88] sm:$0xff]  ;;  %v196_v34 = vld [vmem:[#allocation7 + $0x90] sm:$0xff]  ;;  %v356_v36 = vpack.c.bf16 %v80_v25, %v78_v24  ;;  %v358_v46 = vpack.c.bf16 %v79_v27, %v77_v26 }
  0x3f   :  { %347 = vmatpush1.bf16.msra.mxu0 %v346_v14  ;;  %v178_v30 = vld [vmem:[#allocation7] sm:$0xff]  ;;  %v372_v32 = vpack.c.bf16 %v195_v29, %v194_v28  ;;  %v179_v33 = vld [vmem:[#allocation7 + $0x8] sm:$0xff]  ;;  %v197_v35 = vld [vmem:[#allocation7 + $0x98] sm:$0xff] }
  0x40   :  { %349 = vmatprep.subr.bf16.mxu0 %v348_v15  ;;  %v374_v37 = vpack.c.bf16 %v179_v33, %v178_v30  ;;  %v376_v38 = vpack.c.bf16 %v197_v35, %v196_v34  ;;  %v180_v39 = vld [vmem:[#allocation7 + $0x10] sm:$0xff]  ;;  %v181_v40 = vld [vmem:[#allocation7 + $0x18] sm:$0xff]  ;;  %v198_v41 = vld [vmem:[#allocation7 + $0xa0] sm:$0xff]  ;;  %v95_v34 = vlaneseq }
  0x41   :  { %v82_v42 = vld [vmem:[#allocation5 + $0xa8] sm:$0xff]  ;;  %v84_v43 = vld [vmem:[#allocation5 + $0xb8] sm:$0xff]  ;;  %373 = vmatprep.subr.bf16.mxu1 %v372_v32  ;;  %v378_v45 = vpack.c.bf16 %v181_v40, %v180_v39  ;;  %v81_v47 = vld [vmem:[#allocation5 + $0xa0] sm:$0xff] }
  0x42   :  { %v199_v44 = vld [vmem:[#allocation7 + $0xa8] sm:$0xff]  ;;  %375 = vmatpush3.bf16.msra.mxu1 %v374_v37  ;;  %v182_v49 = vld [vmem:[#allocation7 + $0x20] sm:$0xff]  ;;  %v360_v51 = vpack.c.bf16 %v84_v43, %v82_v42  ;;  %v83_v52 = vld [vmem:[#allocation5 + $0xb0] sm:$0xff]  ;;  %v96_v35 = vshrl.u32 %v95_v34, 7 }
  0x43   :  { %351 = vmatpush1.bf16.msra.mxu0 %v350_v20  ;;  %377 = vmatprep.subr.bf16.mxu1 %v376_v38  ;;  %v380_v48 = vpack.c.bf16 %v199_v44, %v198_v41  ;;  %v183_v50 = vld [vmem:[#allocation7 + $0x28] sm:$0xff]  ;;  %v200_v53 = vld [vmem:[#allocation7 + $0xb0] sm:$0xff]  ;;  %v201_v54 = vld [vmem:[#allocation7 + $0xb8] sm:$0xff]  ;;  %v362_v58 = vpack.c.bf16 %v83_v52, %v81_v47 }
  0x44   :  { %353 = vmatprep.subr.bf16.mxu0 %v352_v21  ;;  %v86_v55 = vld [vmem:[#allocation5 + $0xc8] sm:$0xff]  ;;  %v88_v56 = vld [vmem:[#allocation5 + $0xd8] sm:$0xff]  ;;  %v382_v57 = vpack.c.bf16 %v183_v50, %v182_v49  ;;  %v85_v59 = vld [vmem:[#allocation5 + $0xc0] sm:$0xff]  ;;  %v384_v60 = vpack.c.bf16 %v201_v54, %v200_v53  ;;  %v101_v38 = vsub.s32 1, %v96_v35 }
  0x45   :  { %v184_v61 = vld [vmem:[#allocation7 + $0x30] sm:$0xff]  ;;  %v185_v62 = vld [vmem:[#allocation7 + $0x38] sm:$0xff]  ;;  %v364_v63 = vpack.c.bf16 %v88_v56, %v86_v55  ;;  %v202_v1 = vld [vmem:[#allocation7 + $0xc0] sm:$0xff] }
  0x46   :  { %379 = vmatpush3.bf16.msra.mxu1 %v378_v45  ;;  %v87_v0 = vld [vmem:[#allocation5 + $0xd0] sm:$0xff]  ;;  %v203_v2 = vld [vmem:[#allocation7 + $0xc8] sm:$0xff]  ;;  %v92_v4 = vld [vmem:[#allocation5 + $0xf8] sm:$0xff]  ;;  %v386_v5 = vpack.c.bf16 %v185_v62, %v184_v61 }
  0x47   :  { %355 = vmatpush1.bf16.msra.mxu0 %v354_v31  ;;  %381 = vmatprep.subr.bf16.mxu1 %v380_v48  ;;  %v90_v3 = vld [vmem:[#allocation5 + $0xe8] sm:$0xff]  ;;  %v366_v6 = vpack.c.bf16 %v87_v0, %v85_v59  ;;  %v89_v7 = vld [vmem:[#allocation5 + $0xe0] sm:$0xff]  ;;  %v388_v8 = vpack.c.bf16 %v203_v2, %v202_v1  ;;  %v91_v12 = vld [vmem:[#allocation5 + $0xf0] sm:$0xff] }
  0x48   :  { %357 = vmatprep.subr.bf16.mxu0 %v356_v36  ;;  %v186_v9 = vld [vmem:[#allocation7 + $0x40] sm:$0xff]  ;;  %v187_v10 = vld [vmem:[#allocation7 + $0x48] sm:$0xff]  ;;  %v368_v11 = vpack.c.bf16 %v92_v4, %v90_v3  ;;  %v204_v13 = vld [vmem:[#allocation7 + $0xd0] sm:$0xff]  ;;  %v370_v16 = vpack.c.bf16 %v91_v12, %v89_v7  ;;  %v97_v36 = vsub.s32 0, %v96_v35 }
  0x49   :  { %v205_v14 = vld [vmem:[#allocation7 + $0xd8] sm:$0xff]  ;;  %v390_v15 = vpack.c.bf16 %v187_v10, %v186_v9  ;;  %v188_v18 = vld [vmem:[#allocation7 + $0x50] sm:$0xff]  ;;  %v206_v20 = vld [vmem:[#allocation7 + $0xe0] sm:$0xff] }
  0x4a   :  { %383 = vmatpush3.bf16.msra.mxu1 %v382_v57  ;;  %v392_v17 = vpack.c.bf16 %v205_v14, %v204_v13  ;;  %v189_v19 = vld [vmem:[#allocation7 + $0x58] sm:$0xff]  ;;  %v207_v21 = vld [vmem:[#allocation7 + $0xe8] sm:$0xff]  ;;  %v190_v25 = vld [vmem:[#allocation7 + $0x60] sm:$0xff] }
  0x4b   :  { %359 = vmatpush1.bf16.msra.mxu0 %v358_v46  ;;  %385 = vmatprep.subr.bf16.mxu1 %v384_v60  ;;  %v394_v22 = vpack.c.bf16 %v189_v19, %v188_v18  ;;  %v60_v23 = vld [vmem:[#allocation2] sm:$0xff]  ;;  %v396_v24 = vpack.c.bf16 %v207_v21, %v206_v20  ;;  %v191_v26 = vld [vmem:[#allocation7 + $0x68] sm:$0xff]  ;;  %v208_v28 = vld [vmem:[#allocation7 + $0xf0] sm:$0xff] }
  0x4c   :  { %361 = vmatprep.subr.bf16.mxu0 %v360_v51  ;;  %v398_v27 = vpack.c.bf16 %v191_v26, %v190_v25  ;;  %v209_v29 = vld [vmem:[#allocation7 + $0xf8] sm:$0xff]  ;;  %v192_v31 = vld [vmem:[#allocation7 + $0x70] sm:$0xff] }
  0x4d   :  { %v400_v30 = vpack.c.bf16 %v209_v29, %v208_v28  ;;  %v193_v32 = vld [vmem:[#allocation7 + $0x78] sm:$0xff] }
  0x4e   :  { %387 = vmatpush3.bf16.msra.mxu1 %v386_v5  ;;  %v402_v33 = vpack.c.bf16 %v193_v32, %v192_v31  ;;  %v93_v37 = vld [vmem:[%s602_s2] sm:$0x3]  ;;  %s479_s2 = scalar_lea.vmem %s295_s10, 128 }
  0x4f   :  { %363 = vmatpush1.bf16.msra.mxu0 %v362_v58  ;;  %389 = vmatprep.subr.bf16.mxu1 %v388_v8  ;;  %v98_v39 = vrot.slane %v93_v37, %v97_v36  ;;  %v102_v40 = vrot.slane %v93_v37, %v101_v38  ;;  %v304_v48 = vld [vmem:[%s604_s4] ss:$0 sm:$0xff]  ;;  %p480_p10 = scmp.ne.s32.totalorder %s295_s10, %s479_s2  ;;  %p485_p12 = scmp.lt.s32.totalorder %s479_s2, %s479_s2 }
  0x50   :  { %365 = vmatprep.subr.bf16.mxu0 %v364_v63 }
  0x51   :  { %p486_p13 = por %p485_p12, %p484_p11 }
  0x52   :  { %391 = vmatpush3.bf16.msra.mxu1 %v390_v15 }
  0x53   :  { %367 = vmatpush1.bf16.msra.mxu0 %v366_v6  ;;  %393 = vmatprep.subr.bf16.mxu1 %v392_v17  ;;  %p487_p0 = pnand %p486_p13, %p480_p10 }
  0x54   :  { %369 = vmatprep.subr.bf16.mxu0 %v368_v11 }
  0x56   :  { %395 = vmatpush3.bf16.msra.mxu1 %v394_v22 }
  0x57   :  { %371 = vmatpush1.bf16.msra.mxu0 %v370_v16  ;;  %397 = vmatprep.subr.bf16.mxu1 %v396_v24 }
  0x5a   :  { %170 = vmatmul.mubr.f32.vlgmr.msra.gmra.mrb[0].mxu0 %v60_v23  ;;  %399 = vmatpush3.bf16.msra.mxu1 %v398_v27 }
  0x5b   :  { %401 = vmatprep.subr.bf16.mxu1 %v400_v30 }
  0x5e   :  { %403 = vmatpush3.bf16.msra.mxu1 %v402_v33 }
 0x12d   :  { %v171_v41 = vpop.f32.mrb[0].mxu0 }
 0x12e   :  { %v172_v42 = vadd.f32 %v171_v41, %v98_v39  ;;  %v173_v43 = vpop.f32.mrb[1].mxu0 }
 0x12f   :  { %v174_v44 = vadd.f32 %v173_v43, %v102_v40 }
 0x130   :  { %v176_v46 = vmax.f32 %v172_v42, 0.0 }
 0x131   :  { %v177_v45 = vmax.f32 %v174_v44, 0.0 }
 0x133   :  { %281 = vmatprep.mubr.f32.mxu1 %v177_v45 }
 0x134   :  { %282 = vmatmul.mubr.f32.vlgmr.msra.gmra.mrb[0].mxu1 %v176_v46 }
 0x207   :  { %v337_v47 = vpop.f32.mrb[0].mxu1 }
 0x208   :  { %v338_v49 = vpop.f32.mrb[1].mxu1 }
 0x209   :  { %v339_v50 = vadd.f32 %v338_v49, %v337_v47 }
 0x20b   :  { %v284_v51 = vadd.f32 %v339_v50, %v304_v48 }
 0x20d   :  { %287 = vst [vmem:[#allocation8] sm:$0xff] %v284_v51 }
 0x20e   :  { %490 = shalt.err (!%p487_p0)
}
 0x20f   :  { %s491_s13 = scalar_lea.hbm %s605_s5, 128 }
 0x210   :  { %p492_p1 = scmp.ne.s32.totalorder %s605_s5, %s491_s13  ;;  %p495_p2 = scmp.lt.u32.totalorder %s491_s13, %s605_s5 }
 0x212   :  { %p497_p3 = pnand %p495_p2, %p492_p1 }
 0x214   :  { %500 = shalt.err (!%p497_p3)
}
 0x215   :  { %297 = dma.vmem_to_hbm [thread:$0]  %s295_s10, 128, %s605_s5, [#allocation4]  }
 0x216   :  { %505 = dma.done.wait [#allocation4], 128  }
 0x217   :  { %506 = vsyncadd [#allocation4], 4294967168 }
 0x218   :  { %301 = vsyncpa [#allocation3], 1 }
 0x219   :  { %302 = vsyncpa [#allocation6], 1 }
 0x21a   :  { %303 = vsyncpa [#allocation4], 1 }

</bundles_post_ra>
